<compile_context>
chip_gen: v6e
topology: v6e:2x2x1
jax: 0.10.0
libtpu: 0.0.40
codegen_flags: <defaults>
</compile_context>

<pallas_src>
import math

import jax
import jax.numpy as jnp
from jax.experimental import pallas as pl
from jax.experimental.pallas import tpu as pltpu


def _linear_embeddings_kernel_lane_dense(x_ref, w_ref, b_ref, o_ref):
    # x_ref: (TB, F)   w_ref/b_ref: (1, F*D)   o_ref: (TB, F*D)
    tb, f = x_ref.shape
    fd = o_ref.shape[-1]
    d = fd // f
    x = x_ref[...]                                             # (TB, F)
    # Expand x[t, f] -> xb[t, f*D + d] (VMEM-internal relayout; the HBM store
    # stays a full-width, unmasked, contiguous DMA).
    xb = jnp.broadcast_to(x[:, :, None], (tb, f, d)).reshape(tb, fd)
    o_ref[...] = xb * w_ref[...] + b_ref[...]


def _linear_embeddings_kernel_3d(x_ref, w_ref, b_ref, o_ref):
    # x_ref: (TB, F, 1)   w_ref/b_ref: (F, D)   o_ref: (TB, F, D)
    # F on sublanes, D on lanes -> the broadcast of x along D is a pure VPU
    # lane splat (no cross-lane traffic).
    o_ref[...] = x_ref[...] * w_ref[...] + b_ref[...]


def _choose_block_batch(B, row_bytes, tile_budget_bytes=2 * 1024 * 1024):
    """Pick a batch tile: multiple of 8, output tile <= ~2 MiB, capped at 512."""
    tb = tile_budget_bytes // max(row_bytes, 1)
    tb = max(8, min(512, (tb // 8) * 8))
    b_ceil8 = -(-B // 8) * 8
    tb = max(8, min(tb, b_ceil8))
    return tb


def linear_embeddings(x, weight, bias, *, block_batch=None,
                      vmem_limit_bytes=32 * 1024 * 1024):
    """Pallas forward of LinearEmbeddings.

    x: (..., n_features) -> out: (..., n_features, d_embedding)
    """
    assert x.ndim >= 2, "input must have at least two dimensions"
    n_features, d_embedding = weight.shape
    assert bias.shape == (n_features, d_embedding)
    assert x.shape[-1] == n_features

    F, D = n_features, d_embedding
    out_dtype = jnp.result_type(x.dtype, weight.dtype, bias.dtype)
    x = x.astype(out_dtype)
    weight = weight.astype(out_dtype)
    bias = bias.astype(out_dtype)
    itemsize = jnp.dtype(out_dtype).itemsize

    lead_shape = x.shape[:-1]
    B = math.prod(lead_shape)
    x2 = x.reshape(B, F)

    if block_batch is None:
        tb = _choose_block_batch(B, F * D * itemsize)
    else:
        tb = int(block_batch)
        assert tb % 8 == 0 and tb > 0, "block_batch must be a positive multiple of 8"

    n_blocks = -(-B // tb)
    B_pad = n_blocks * tb
    if B_pad != B:
        x2 = jnp.pad(x2, ((0, B_pad - B), (0, 0)))

    compiler_params = pltpu.CompilerParams(
        dimension_semantics=("parallel",),
        vmem_limit_bytes=vmem_limit_bytes,
    )

    if D % 128 != 0:
        # Lane-dense path: write (TB, F*D) blocks -> unmasked full-width stores.
        w_flat = weight.reshape(1, F * D)
        b_flat = bias.reshape(1, F * D)
        out = pl.pallas_call(
            _linear_embeddings_kernel_lane_dense,
            out_shape=jax.ShapeDtypeStruct((B_pad, F * D), out_dtype),
            grid_spec=pltpu.PrefetchScalarGridSpec(
                num_scalar_prefetch=0,
                grid=(n_blocks,),
                in_specs=[
                    pl.BlockSpec((tb, F), lambda i: (i, 0)),
                    pl.BlockSpec((1, F * D), lambda i: (0, 0)),   # resident
                    pl.BlockSpec((1, F * D), lambda i: (0, 0)),   # resident
                ],
                out_specs=pl.BlockSpec((tb, F * D), lambda i: (i, 0)),
            ),
            compiler_params=compiler_params,
        )(x2, w_flat, b_flat)
    else:
        # D is already a multiple of 128 -> 3-D blocks are lane-dense as-is.
        x3 = x2.reshape(B_pad, F, 1)
        out = pl.pallas_call(
            _linear_embeddings_kernel_3d,
            out_shape=jax.ShapeDtypeStruct((B_pad, F, D), out_dtype),
            grid_spec=pltpu.PrefetchScalarGridSpec(
                num_scalar_prefetch=0,
                grid=(n_blocks,),
                in_specs=[
                    pl.BlockSpec((tb, F, 1), lambda i: (i, 0, 0)),
                    pl.BlockSpec((F, D), lambda i: (0, 0)),       # resident
                    pl.BlockSpec((F, D), lambda i: (0, 0)),       # resident
                ],
                out_specs=pl.BlockSpec((tb, F, D), lambda i: (i, 0, 0)),
            ),
            compiler_params=compiler_params,
        )(x3, weight, bias)

    out = out[:B]
    return out.reshape(*lead_shape, F, D)


def init_linear_embeddings_params(key, n_features, d_embedding, dtype=jnp.float32):
    """Deterministic init matching reset_parameters: U(-d**-0.5, d**-0.5)."""
    d_rsqrt = d_embedding ** (-0.5)
    kw, kb = jax.random.split(key)
    weight = jax.random.uniform(
        kw, (n_features, d_embedding), dtype, minval=-d_rsqrt, maxval=d_rsqrt
    )
    bias = jax.random.uniform(
        kb, (n_features, d_embedding), dtype, minval=-d_rsqrt, maxval=d_rsqrt
    )
    return weight, bias


if __name__ == "__main__":
    key = jax.random.PRNGKey(0)
    k1, k2, k3, kp1, kp2, kp3 = jax.random.split(key, 6)

    # Case 1: module docstring shapes (lane-dense path, D=4 < 128).
    x1 = jax.random.normal(k1, (2, 3), jnp.float32)
    w1, b1 = init_linear_embeddings_params(kp1, 3, 4)
    out1 = jax.block_until_ready(linear_embeddings(x1, w1, b1))
    ref1 = x1[..., None] * w1 + b1[None]
    assert out1.shape == (2, 3, 4)
    assert jnp.allclose(out1, ref1, atol=1e-6), "case 1 mismatch vs reference"

    # Case 2: 3-D leading dims, D multiple of 128 (aligned 3-D store path).
    x2 = jax.random.normal(k2, (4, 5, 8), jnp.float32)
    w2, b2 = init_linear_embeddings_params(kp2, 8, 128)
    out2 = jax.block_until_ready(linear_embeddings(x2, w2, b2))
    ref2 = x2[..., None] * w2 + b2
    assert out2.shape == (4, 5, 8, 128)
    assert jnp.allclose(out2, ref2, atol=1e-6), "case 2 mismatch vs reference"

    # Case 3: batch not divisible by the tile -> padding + multi-step grid.
    x3 = jax.random.normal(k3, (520, 16), jnp.float32)
    w3, b3 = init_linear_embeddings_params(kp3, 16, 8)
    out3 = jax.block_until_ready(linear_embeddings(x3, w3, b3, block_batch=128))
    ref3 = x3[..., None] * w3 + b3
    assert out3.shape == (520, 16, 8)
    assert jnp.allclose(out3, ref3, atol=1e-6), "case 3 mismatch vs reference"

    print("KERNEL_OK")
</pallas_src>

<mosaic_0001>
module attributes {stable_mosaic.version = 11 : i64} {
  func.func @_linear_embeddings_kernel_lane_dense(%arg0: i32, %arg1: memref<8x3xf32, #tpu.memory_space<vmem>>, %arg2: memref<1x12xf32, #tpu.memory_space<vmem>>, %arg3: memref<1x12xf32, #tpu.memory_space<vmem>>, %arg4: memref<8x12xf32, #tpu.memory_space<vmem>>) attributes {dimension_semantics = [#tpu.dimension_semantics<parallel>], iteration_bounds = array<i64: 1>, scalar_prefetch = 0 : i64, scratch_operands = 0 : i64, tpu.core_type = #tpu.core_type<tc>, window_params = [{transform_indices = @transform_0, window_bounds = array<i64: 8, 3>}, {pipeline_mode = #tpu.pipeline_mode<synchronous>, transform_indices = @transform_1, window_bounds = array<i64: 1, 12>}, {pipeline_mode = #tpu.pipeline_mode<synchronous>, transform_indices = @transform_2, window_bounds = array<i64: 1, 12>}, {transform_indices = @transform_3, window_bounds = array<i64: 8, 12>}]} {
    %c0 = arith.constant 0 : index
    %c0_0 = arith.constant 0 : index
    %0 = vector.load %arg1[%c0, %c0_0] : memref<8x3xf32, #tpu.memory_space<vmem>>, vector<8x3xf32>
    %1 = vector.shape_cast %0 : vector<8x3xf32> to vector<8x3x1xf32>
    %2 = vector.shape_cast %1 : vector<8x3x1xf32> to vector<8x3x1xf32>
    %3 = vector.broadcast %2 : vector<8x3x1xf32> to vector<8x3x4xf32>
    %4 = vector.shape_cast %3 : vector<8x3x4xf32> to vector<8x12xf32>
    %c0_1 = arith.constant 0 : index
    %c0_2 = arith.constant 0 : index
    %5 = vector.load %arg2[%c0_1, %c0_2] : memref<1x12xf32, #tpu.memory_space<vmem>>, vector<1x12xf32>
    %6 = vector.broadcast %5 : vector<1x12xf32> to vector<8x12xf32>
    %7 = arith.mulf %4, %6 : vector<8x12xf32>
    %c0_3 = arith.constant 0 : index
    %c0_4 = arith.constant 0 : index
    %8 = vector.load %arg3[%c0_3, %c0_4] : memref<1x12xf32, #tpu.memory_space<vmem>>, vector<1x12xf32>
    %9 = vector.broadcast %8 : vector<1x12xf32> to vector<8x12xf32>
    %10 = arith.addf %7, %9 : vector<8x12xf32>
    %c0_5 = arith.constant 0 : index
    %c0_6 = arith.constant 0 : index
    %11 = vector.load %arg4[%c0_5, %c0_6] : memref<8x12xf32, #tpu.memory_space<vmem>>, vector<8x12xf32>
    tpu.vector_store %arg4[%c0_5, %c0_6], %10 {strides = array<i32>} : memref<8x12xf32, #tpu.memory_space<vmem>>, vector<8x12xf32>,
    return
  }
  func.func @transform_0(%arg0: i32) -> (i32, i32) {
    %c0_i32 = arith.constant 0 : i32
    %c0_i32_0 = arith.constant 0 : i32
    return %arg0, %c0_i32 : i32, i32
  }
  func.func @transform_1(%arg0: i32) -> (i32, i32) {
    %c0_i32 = arith.constant 0 : i32
    %c0_i32_0 = arith.constant 0 : i32
    %c0_i32_1 = arith.constant 0 : i32
    return %c0_i32, %c0_i32_0 : i32, i32
  }
  func.func @transform_2(%arg0: i32) -> (i32, i32) {
    %c0_i32 = arith.constant 0 : i32
    %c0_i32_0 = arith.constant 0 : i32
    %c0_i32_1 = arith.constant 0 : i32
    return %c0_i32, %c0_i32_0 : i32, i32
  }
  func.func @transform_3(%arg0: i32) -> (i32, i32) {
    %c0_i32 = arith.constant 0 : i32
    %c0_i32_0 = arith.constant 0 : i32
    return %arg0, %c0_i32 : i32, i32
  }
}

</mosaic_0001>

<bundles_post_ra>
// kernel: tpu_custom_call.1
= control target key start
LH: loop header
LB: loop body
LE: loop exit
PB: predicated region body
PF: predicated region fallthrough
CT: control target
= control target key end

     0   :  { %v16_v0 = vlaneseq  ;;  %s249_s0 = inlined_call_operand.vmem [shape: f32[8,3], index: 0, kind: input, shape index: {}]   ;;  %s250_s1 = inlined_call_operand.vmem [shape: f32[1,12], index: 1, kind: input, shape index: {}]   ;;  %s251_s2 = inlined_call_operand.vmem [shape: f32[1,12], index: 2, kind: input, shape index: {}]   ;;  %s252_s3 = inlined_call_operand.hbm [shape: f32[8,12], index: 3, kind: output, shape index: {}]  }
   0x1   :  { %8 = vsyncpa [#allocation3], 0  ;;  %v15_v2 = vld [vmem:[%s249_s0] sm:$0xff]  ;;  %v212_v21 = vmov 1983009808   ;;  %s214_s0 = smov 8  }
   0x2   :  { %v17_v1 = vshrl.u32 %v16_v0, 7  ;;  %v74_v22 = vunpack.c.l.s4 %v212_v21  ;;  %v213_v26 = vmov 1934713408   ;;  %s215_s14 = smov 4   ;;  %vm147_vm0 = vcmask 31744   ;;  %s216_s19 = smov [#allocation2]  }
   0x3   :  { %v107_v27 = vunpack.c.l.s4 %v213_v26  ;;  %vm149_vm1 = vcmask 64512   ;;  %v183_v55 = vld [vmem:[%s250_s1] ss:$0 sm:$0xff]  ;;  %s175_s20 = sshll.u32 %s216_s19, 4  ;;  %vm167_vm2 = vcmask 97280   ;;  %s176_s20 = int_to_ptr.vmem [resolvable:$true] %s175_s20 }
   0x4   :  { %v32_v3 = vsub.s32 2, %v17_v1  ;;  %v18_v4 = vsub.s32 0, %v17_v1  ;;  %v39_v5 = vsub.s32 3, %v17_v1  ;;  %v25_v6 = vsub.s32 1, %v17_v1  ;;  %v184_v59 = vld [vmem:[%s251_s2] ss:$0 sm:$0xff]  ;;  %p195_p1 = scmp.lt.s32.totalorder %s176_s20, %s176_s20 }
   0x5   :  { %v53_v11 = vsub.s32 5, %v17_v1  ;;  %v46_v12 = vsub.s32 4, %v17_v1  ;;  %v67_v15 = vsub.s32 7, %v17_v1  ;;  %v60_v16 = vsub.s32 6, %v17_v1  ;;  %s190_s21 = scalar_lea.vmem %s176_s20, 128 }
   0x6   :  { %v33_v7 = vrot.slane %v15_v2, %v32_v3  ;;  %v19_v8 = vrot.slane %v15_v2, %v18_v4  ;;  %v40_v9 = vrot.slane %v15_v2, %v39_v5  ;;  %v26_v10 = vrot.slane %v15_v2, %v25_v6  ;;  %p191_p0 = scmp.ne.s32.totalorder %s176_s20, %s190_s21  ;;  %p196_p2 = scmp.lt.s32.totalorder %s190_s21, %s190_s21 }
   0x7   :  { %v54_v13 = vrot.slane %v15_v2, %v53_v11  ;;  %v47_v14 = vrot.slane %v15_v2, %v46_v12  ;;  %v68_v17 = vrot.slane %v15_v2, %v67_v15  ;;  %v61_v18 = vrot.slane %v15_v2, %v60_v16 }
   0x8   :  { %35 = vbcast.lane.b32.xlu1 %v33_v7, 256  ;;  %21 = vbcast.lane.b32.xlu0 %v19_v8, 256  ;;  %v75_v25 = vunpack.c.0.s8 %v74_v22  ;;  %v108_v33 = vunpack.c.0.s8 %v107_v27  ;;  %p197_p3 = por %p196_p2, %p195_p1 }
   0xa   :  { %v78_v31 = vsub.s32 %v75_v25, %v17_v1  ;;  %v111_v40 = vsub.s32 %v108_v33, %v17_v1  ;;  %p198_p4 = pnand %p197_p3, %p191_p0 }
   0xc   :  { %42 = vbcast.lane.b32.xlu1 %v40_v9, 256  ;;  %28 = vbcast.lane.b32.xlu0 %v26_v10, 256 }
  0x10   :  { %56 = vbcast.lane.b32.xlu1 %v54_v13, 256  ;;  %49 = vbcast.lane.b32.xlu0 %v47_v14, 256 }
  0x14   :  { %70 = vbcast.lane.b32.xlu1 %v68_v17, 256  ;;  %63 = vbcast.lane.b32.xlu0 %v61_v18, 256 }
  0x7a   :  { %v36_v19 = vpop.permute.xlu1 %35  ;;  %v22_v20 = vpop.permute.xlu0 %21 }
  0x7b   :  { %v72_v32 = vcombine.low %v22_v20, %v36_v19 }
  0x7d   :  { %v79_v37 = vrot.slane %v72_v32, %v78_v31 }
  0x7e   :  { %v43_v23 = vpop.permute.xlu1 %42  ;;  %v29_v24 = vpop.permute.xlu0 %28 }
  0x7f   :  { %v80_v28 = vcombine.low %v29_v24, %v43_v23 }
  0x81   :  { %v87_v34 = vrot.slane %v80_v28, %v78_v31 }
  0x82   :  { %v57_v29 = vpop.permute.xlu1 %56  ;;  %v50_v30 = vpop.permute.xlu0 %49 }
  0x83   :  { %v104_v41 = vcombine.low %v79_v37, %v87_v34  ;;  %v105_v42 = vcombine.high %v79_v37, %v87_v34 }
  0x85   :  { %v119_v47 = vrot.slane %v105_v42, %v111_v40  ;;  %v112_v49 = vrot.slane %v104_v41, %v111_v40 }
  0x86   :  { %v71_v35 = vpop.permute.xlu1 %70  ;;  %v64_v36 = vpop.permute.xlu0 %63 }
  0x87   :  { %v96_v38 = vcombine.low %v57_v29, %v71_v35  ;;  %v88_v39 = vcombine.low %v50_v30, %v64_v36 }
  0x89   :  { %v103_v43 = vrot.slane %v96_v38, %v78_v31  ;;  %v95_v44 = vrot.slane %v88_v39, %v78_v31 }
  0x8b   :  { %v120_v45 = vcombine.low %v95_v44, %v103_v43  ;;  %v121_v46 = vcombine.high %v95_v44, %v103_v43 }
  0x8d   :  { %v135_v48 = vrot.slane %v121_v46, %v111_v40  ;;  %v128_v50 = vrot.slane %v120_v45, %v111_v40 }
  0x8f   :  { %v138_v51 = vcombine.low %v119_v47, %v135_v48  ;;  %v137_v52 = vcombine.high %v112_v49, %v128_v50  ;;  %v136_v53 = vcombine.low %v112_v49, %v128_v50 }
  0x91   :  { %144 = vrot.lane.b32.xlu1 %v138_v51, %s214_s0  ;;  %140 = vrot.lane.b32.xlu0 %v137_v52, %s215_s14 }
 0x103   :  { %v145_v54 = vpop.permute.xlu1 %144  ;;  %v141_v56 = vpop.permute.xlu0 %140 }
 0x104   :  { %v148_v57 = vsel %vm147_vm0, %v136_v53, %v141_v56 }
 0x105   :  { %v150_v58 = vsel %vm149_vm1, %v148_v57, %v145_v54 }
 0x106   :  { %v158_v60 = vmul.f32 %v183_v55, %v150_v58 }
 0x108   :  { %v166_v61 = vadd.f32 %v184_v59, %v158_v60 }
 0x10a   :  { %168 = vst.msk [vmem:[#allocation2] sm:$0xff] %vm167_vm2, %v166_v61 }
 0x10b   :  { %201 = shalt.err (!%p198_p4)
}
 0x10c   :  { %178 = dma.vmem_to_hbm [thread:$0]  %s176_s20, 128, %s252_s3, [#allocation3]  }
 0x10d   :  { %210 = dma.done.wait [#allocation3], 128  }
 0x10e   :  { %211 = vsyncadd [#allocation3], 4294967168 }
 0x10f   :  { %182 = vsyncpa [#allocation3], 1 }

</bundles_post_ra>
